<compile_context>
chip_gen: v6e
topology: v6e:2x2x1
jax: 0.10.0
libtpu: 0.0.40
codegen_flags: <defaults>
</compile_context>

<pallas_src>
import jax
import jax.numpy as jnp
from jax.experimental import pallas as pl
from jax.experimental.pallas import tpu as pltpu

# ---- module hyperparameters (synthetic __C) ----
HSIZE = 128            # __C.HSIZE
MID = HSIZE * 4        # mid_size = HSIZE * 4
B, S = 2, 8            # small (n_batches, seq) example
TM = 8                 # rows per grid step (sublane-aligned for f32)


def ffn_kernel(x_ref, w1_ref, b1_ref, w2_ref, b2_ref, o_ref):
    # x_ref: (TM, H); w1_ref: (H, MID); b1_ref: (1, MID)
    # w2_ref: (MID, H); b2_ref: (1, H); o_ref: (TM, H)
    x = x_ref[...].astype(jnp.float32)

    # FC: linear + ReLU   (dropout is identity in eval mode)
    h = jnp.dot(x, w1_ref[...], preferred_element_type=jnp.float32) + b1_ref[...]
    h = jnp.maximum(h, 0.0)

    # second Linear
    y = jnp.dot(h, w2_ref[...], preferred_element_type=jnp.float32) + b2_ref[...]

    o_ref[...] = y.astype(o_ref.dtype)


def ffn(x, w1, b1, w2, b2):
    """x: (B, S, HSIZE) f32.
    w1: (MID, HSIZE), b1: (MID,), w2: (HSIZE, MID), b2: (HSIZE,)  (PyTorch Linear layout).
    """
    Bx, Sx, Hx = x.shape
    rows = Bx * Sx
    assert rows % TM == 0 and Hx == HSIZE

    # one-time parameter prep (transposed to (in, out); biases made 2D)
    w1_t = w1.T                     # (HSIZE, MID)
    w2_t = w2.T                     # (MID, HSIZE)
    b1_2 = b1.reshape(1, MID)
    b2_2 = b2.reshape(1, Hx)

    x2 = x.reshape(rows, Hx)        # lane-dense (B*S, H) slab

    out2 = pl.pallas_call(
        ffn_kernel,
        out_shape=jax.ShapeDtypeStruct((rows, Hx), x.dtype),
        grid_spec=pltpu.PrefetchScalarGridSpec(
            num_scalar_prefetch=0,
            grid=(rows // TM,),
            in_specs=[
                pl.BlockSpec((TM, Hx), lambda i: (i, 0)),
                pl.BlockSpec((Hx, MID), lambda i: (0, 0)),
                pl.BlockSpec((1, MID), lambda i: (0, 0)),
                pl.BlockSpec((MID, Hx), lambda i: (0, 0)),
                pl.BlockSpec((1, Hx), lambda i: (0, 0)),
            ],
            out_specs=pl.BlockSpec((TM, Hx), lambda i: (i, 0)),
        ),
        compiler_params=pltpu.CompilerParams(
            dimension_semantics=("parallel",)),
    )(x2, w1_t, b1_2, w2_t, b2_2)

    return out2.reshape(Bx, Sx, Hx)


if __name__ == "__main__":
    key = jax.random.PRNGKey(0)
    kx, k1, kb1, k2, kb2 = jax.random.split(key, 5)

    x = jax.random.normal(kx, (B, S, HSIZE), dtype=jnp.float32)

    # deterministic parameter init (synthetic; PyTorch Linear layout: (out, in))
    w1 = jax.random.normal(k1, (MID, HSIZE), dtype=jnp.float32) * 0.05
    b1 = jax.random.normal(kb1, (MID,), dtype=jnp.float32) * 0.05
    w2 = jax.random.normal(k2, (HSIZE, MID), dtype=jnp.float32) * 0.05
    b2 = jax.random.normal(kb2, (HSIZE,), dtype=jnp.float32) * 0.05

    out = ffn(x, w1, b1, w2, b2)
    out = jax.block_until_ready(out)

    # pure-JAX reference of the same math
    h_ref = jnp.maximum(x @ w1.T + b1, 0.0)
    ref = h_ref @ w2.T + b2

    assert out.shape == ref.shape
    assert jnp.allclose(out, ref, atol=1e-4, rtol=1e-4), "mismatch vs reference"
    print("KERNEL_OK")
</pallas_src>

<mosaic_0001>
module attributes {stable_mosaic.version = 11 : i64} {
  func.func @ffn_kernel(%arg0: i32, %arg1: memref<8x128xf32, #tpu.memory_space<vmem>>, %arg2: memref<128x512xf32, #tpu.memory_space<vmem>>, %arg3: memref<1x512xf32, #tpu.memory_space<vmem>>, %arg4: memref<512x128xf32, #tpu.memory_space<vmem>>, %arg5: memref<1x128xf32, #tpu.memory_space<vmem>>, %arg6: memref<8x128xf32, #tpu.memory_space<vmem>>) attributes {dimension_semantics = [#tpu.dimension_semantics<parallel>], iteration_bounds = array<i64: 2>, scalar_prefetch = 0 : i64, scratch_operands = 0 : i64, tpu.core_type = #tpu.core_type<tc>, window_params = [{transform_indices = @transform_0, window_bounds = array<i64: 8, 128>}, {pipeline_mode = #tpu.pipeline_mode<synchronous>, transform_indices = @transform_1, window_bounds = array<i64: 128, 512>}, {pipeline_mode = #tpu.pipeline_mode<synchronous>, transform_indices = @transform_2, window_bounds = array<i64: 1, 512>}, {pipeline_mode = #tpu.pipeline_mode<synchronous>, transform_indices = @transform_3, window_bounds = array<i64: 512, 128>}, {pipeline_mode = #tpu.pipeline_mode<synchronous>, transform_indices = @transform_4, window_bounds = array<i64: 1, 128>}, {transform_indices = @transform_5, window_bounds = array<i64: 8, 128>}]} {
    %c0 = arith.constant 0 : index
    %c0_0 = arith.constant 0 : index
    %0 = vector.load %arg1[%c0, %c0_0] : memref<8x128xf32, #tpu.memory_space<vmem>>, vector<8x128xf32>
    %c0_1 = arith.constant 0 : index
    %c0_2 = arith.constant 0 : index
    %1 = vector.load %arg2[%c0_1, %c0_2] : memref<128x512xf32, #tpu.memory_space<vmem>>, vector<128x512xf32>
    %cst = arith.constant dense<0.000000e+00> : vector<8x512xf32>
    %2 = tpu.matmul %0, %1, %cst {dimension_numbers = #tpu.dot_dimension_numbers<[1], [0], [0], [1], [0, 0, 1, 1], [], []>} : vector<8x128xf32>, vector<128x512xf32>, vector<8x512xf32> -> vector<8x512xf32>
    %c0_3 = arith.constant 0 : index
    %c0_4 = arith.constant 0 : index
    %3 = vector.load %arg3[%c0_3, %c0_4] : memref<1x512xf32, #tpu.memory_space<vmem>>, vector<1x512xf32>
    %4 = vector.broadcast %3 : vector<1x512xf32> to vector<8x512xf32>
    %5 = arith.addf %2, %4 : vector<8x512xf32>
    %cst_5 = arith.constant 0.000000e+00 : f32
    %6 = vector.broadcast %cst_5 : f32 to vector<8x512xf32>
    %7 = arith.maximumf %5, %6 : vector<8x512xf32>
    %c0_6 = arith.constant 0 : index
    %c0_7 = arith.constant 0 : index
    %8 = vector.load %arg4[%c0_6, %c0_7] : memref<512x128xf32, #tpu.memory_space<vmem>>, vector<512x128xf32>
    %cst_8 = arith.constant dense<0.000000e+00> : vector<8x128xf32>
    %9 = tpu.matmul %7, %8, %cst_8 {dimension_numbers = #tpu.dot_dimension_numbers<[1], [0], [0], [1], [0, 0, 1, 1], [], []>} : vector<8x512xf32>, vector<512x128xf32>, vector<8x128xf32> -> vector<8x128xf32>
    %c0_9 = arith.constant 0 : index
    %c0_10 = arith.constant 0 : index
    %10 = vector.load %arg5[%c0_9, %c0_10] : memref<1x128xf32, #tpu.memory_space<vmem>>, vector<1x128xf32>
    %11 = vector.broadcast %10 : vector<1x128xf32> to vector<8x128xf32>
    %12 = arith.addf %9, %11 : vector<8x128xf32>
    %c0_11 = arith.constant 0 : index
    %c0_12 = arith.constant 0 : index
    %13 = vector.load %arg6[%c0_11, %c0_12] : memref<8x128xf32, #tpu.memory_space<vmem>>, vector<8x128xf32>
    tpu.vector_store %arg6[%c0_11, %c0_12], %12 {strides = array<i32>} : memref<8x128xf32, #tpu.memory_space<vmem>>, vector<8x128xf32>,
    return
  }
  func.func @transform_0(%arg0: i32) -> (i32, i32) {
    %c0_i32 = arith.constant 0 : i32
    %c0_i32_0 = arith.constant 0 : i32
    return %arg0, %c0_i32 : i32, i32
  }
  func.func @transform_1(%arg0: i32) -> (i32, i32) {
    %c0_i32 = arith.constant 0 : i32
    %c0_i32_0 = arith.constant 0 : i32
    %c0_i32_1 = arith.constant 0 : i32
    return %c0_i32, %c0_i32_0 : i32, i32
  }
  func.func @transform_2(%arg0: i32) -> (i32, i32) {
    %c0_i32 = arith.constant 0 : i32
    %c0_i32_0 = arith.constant 0 : i32
    %c0_i32_1 = arith.constant 0 : i32
    return %c0_i32, %c0_i32_0 : i32, i32
  }
  func.func @transform_3(%arg0: i32) -> (i32, i32) {
    %c0_i32 = arith.constant 0 : i32
    %c0_i32_0 = arith.constant 0 : i32
    %c0_i32_1 = arith.constant 0 : i32
    return %c0_i32, %c0_i32_0 : i32, i32
  }
  func.func @transform_4(%arg0: i32) -> (i32, i32) {
    %c0_i32 = arith.constant 0 : i32
    %c0_i32_0 = arith.constant 0 : i32
    %c0_i32_1 = arith.constant 0 : i32
    return %c0_i32, %c0_i32_0 : i32, i32
  }
  func.func @transform_5(%arg0: i32) -> (i32, i32) {
    %c0_i32 = arith.constant 0 : i32
    %c0_i32_0 = arith.constant 0 : i32
    return %arg0, %c0_i32 : i32, i32
  }
}

</mosaic_0001>

<bundles_post_ra>
// kernel: tpu_custom_call.1
= control target key start
LH: loop header
LB: loop body
LE: loop exit
PB: predicated region body
PF: predicated region fallthrough
CT: control target
= control target key end

     0   :  { %10 = vsyncpa [#allocation3], 0  ;;  %s1418_s0 = inlined_call_operand.hbm [shape: f32[16,128], index: 0, kind: input, shape index: {}]   ;;  %s1419_s1 = inlined_call_operand.hbm [shape: f32[128,512], index: 1, kind: input, shape index: {}]   ;;  %s1420_s2 = inlined_call_operand.hbm [shape: f32[1,512], index: 2, kind: input, shape index: {}]   ;;  %s1421_s3 = inlined_call_operand.hbm [shape: f32[512,128], index: 3, kind: input, shape index: {}]   ;;  %s1422_s4 = inlined_call_operand.vmem [shape: f32[1,128], index: 4, kind: input, shape index: {}]   ;;  %s1423_s5 = inlined_call_operand.hbm [shape: f32[16,128], index: 5, kind: output, shape index: {}]  }
   0x1   :  { %12 = vsyncpa [#allocation3 + $0x1], 0 }
   0x2   :  { %13 = vsyncpa [#allocation6], 0 }
   0x3   :  { %14 = vsyncpa [#allocation9], 0 }
   0x4   :  { %15 = vsyncpa [#allocation4], 0 }
   0x5   :  { %17 = vsyncpa [#allocation4 + $0x1], 0  ;;  %s1231_s18 = smov 0   ;;  %s1233_s19 = smov 0  }
   0x6   :  { %s1235_s20 = smov 0   ;;  %s1237_s21 = smov 0  }
   0x7 LB: > { %s1252_s22 = sadd.s32 4294967295, %s1189_s21   ;;  %s840_s23 = sadd.s32 4294967294, %s1189_s21   ;;  %s1189_s21 = sphi %s1237_s21, %s1447_s21   ;;  %s1185_s20 = sphi %s1235_s20, %s1446_s20   ;;  %s1181_s19 = sphi %s1233_s19, %s1445_s19   ;;  %s1177_s18 = sphi %s1231_s18, %s1444_s18  }
   0x8   : > { %p43_p0 = scmp.ne.s32.totalorder %s1181_s19, %s1177_s18  ;;  %p1424_p1 = scmp.eq.s32.totalorder %s1252_s22, 0 }
   0x9   : > { %p157_p3 = scmp.eq.s32.totalorder %s840_s23, 1  ;;  %p841_p5 = scmp.ge.s32.totalorder %s1189_s21, 1 }
   0xa   : > { %p1261_p4 = por %p1424_p1, %p43_p0  ;;  %p164_p7 = scmp.lt.s32.totalorder %s1189_s21, 3 }
   0xb   : > { %p1266_p6 = por %p157_p3, %p43_p0  ;;  %s1191_s27 = smov [#allocation5]  }
   0xc   : > { %s1428_s24 = scalar_select %p1261_p4, 1, 0 }
   0xd   : > { %s1429_s25 = scalar_select %p1266_p6, 1, 0 }
   0xe   : > { %p1271_p8 = pnand %p841_p5, %p164_p7  ;;  %s176_s28 = sshll.u32 %s1191_s27, 4  ;;  %s177_s28 = int_to_ptr.vmem [resolvable:$true] %s176_s28 }
   0xf   : > { %s1192_s30 = smov [#allocation7]   ;;  %s1193_s7 = smov [#allocation8]  }
  0x10   : > { %s1430_s26 = scalar_select %p1271_p8, 1, 0 }
  0x11   : > { %p945_p9 = pneg %p1271_p8  ;;  %s190_s6 = sshll.u32 %s1192_s30, 4  ;;  %s191_s6 = int_to_ptr.vmem [resolvable:$true] %s190_s6 }
  0x12   : > { %s200_s8 = sshll.u32 %s1193_s7, 4  ;;  %s1022_s9 = scalar_lea.vmem %s177_s28, 8192  ;;  %s201_s8 = int_to_ptr.vmem [resolvable:$true] %s200_s8 }
  0x13   : > { %p1280_p11 = pnand %p945_p9, %p1424_p1  ;;  %p1023_p13 = scmp.ne.s32.totalorder %s177_s28, %s1022_s9 }
  0x14   : > { %p1030_p5 = scmp.lt.s32.totalorder %s177_s28, %s177_s28  ;;  %p1031_p7 = scmp.lt.s32.totalorder %s1022_s9, %s1022_s9 }
  0x15   : > { %p1013_p12 = pneg %p1280_p11 }
  0x16   : > { %p1032_p9 = por %p1031_p7, %p1030_p5 }
  0x17   : > { %p1025_p0 = pnand %p1023_p13, %p1013_p12 }
  0x19   : > { %p1026_p3 = pneg %p1025_p0 }
  0x1b   : > { %p1033_p10 = pnand %p1032_p9, %p1026_p3 }
  0x1d   : > { %1036 = shalt.err (!%p1033_p10)
}
  0x1e   : > { %s1194_s10 = smov 512   ;;  %s1195_s11 = smov 32  }
  0x1f   : > { %948 = dma.hbm_to_vmem [thread:$0]  (!%p1280_p11), %s1419_s1, 8192, %s177_s28, [#allocation6], %s1194_s10, %s1194_s10, %s1195_s11  }
  0x20   : > { %s1048_s14 = scalar_lea.vmem %s191_s6, 64  ;;  %p1056_p2 = scmp.lt.s32.totalorder %s191_s6, %s191_s6 }
  0x21   : > { %p1049_p1 = scmp.ne.s32.totalorder %s191_s6, %s1048_s14  ;;  %p1057_p6 = scmp.lt.s32.totalorder %s1048_s14, %s1048_s14 }
  0x23   : > { %p1051_p13 = pnand %p1049_p1, %p1013_p12  ;;  %p1058_p5 = por %p1057_p6, %p1056_p2 }
  0x25   : > { %p1052_p0 = pneg %p1051_p13 }
  0x27   : > { %p1059_p3 = pnand %p1058_p5, %p1052_p0 }
  0x29   : > { %1062 = shalt.err (!%p1059_p3)
}
  0x2a   : > { %951 = dma.hbm_to_vmem [thread:$0]  (!%p1280_p11), %s1420_s2, 64, %s191_s6, [#allocation6]  }
  0x2b   : > { %s1074_s17 = scalar_lea.vmem %s201_s8, 8192  ;;  %p1082_p9 = scmp.lt.s32.totalorder %s201_s8, %s201_s8 }
  0x2c   : > { %p1075_p10 = scmp.ne.s32.totalorder %s201_s8, %s1074_s17  ;;  %p1083_p13 = scmp.lt.s32.totalorder %s1074_s17, %s1074_s17 }
  0x2e   : > { %p1077_p7 = pnand %p1075_p10, %p1013_p12  ;;  %p1084_p4 = por %p1083_p13, %p1082_p9 }
  0x30   : > { %p1078_p1 = pneg %p1077_p7 }
  0x32   : > { %p1085_p2 = pnand %p1084_p4, %p1078_p1 }
  0x34   : > { %1088 = shalt.err (!%p1085_p2)
}
  0x35   : > { %s1196_s23 = smov 128   ;;  %s1197_s27 = smov 8  }
  0x36   : > { %954 = dma.hbm_to_vmem [thread:$0]  (!%p1280_p11), %s1421_s3, 8192, %s201_s8, [#allocation9], %s1196_s23, %s1196_s23, %s1197_s27  }
  0x37   : > { %s1311_s6 = sadd.s32 1, %s1189_s21   ;;  %s30_s9 = sadd.s32 1, %s1185_s20 }
  0x38   : > { %s27_s7 = ssub.s32 %s1189_s21, %s1311_s6  ;;  %p37_p6 = scmp.ne.s32.totalorder %s1185_s20, %s1181_s19 }
  0x39   : > { %p28_p4 = scmp.eq.s32.totalorder %s27_s7, 0  ;;  %p38_p12 = scmp.eq.s32.totalorder %s1189_s21, 0 }
  0x3a   : > { %p966_p0 = scmp.lt.s32.totalorder %s1189_s21, 2  ;;  %p1432_p3 = scmp.eq.s32.totalorder %s1252_s22, 1 }
  0x3b   : > { %s1321_s10 = scalar_select %p28_p4, %s1185_s20, %s30_s9  }
  0x3c   : > { %p39_p5 = por %p38_p12, %p37_p6  ;;  %p1325_p10 = por %p1432_p3, %p37_p6 }
  0x3d   : > { %s217_s29 = sand.u32 1, %s1185_s20   ;;  %s847_s12 = sshll.u32 %s1189_s21, 7 }
  0x3e   : > { %s1433_s11 = scalar_select %p1325_p10, 1, 0 }
  0x3f   : > { %s846_s8 = sshll.u32 %s217_s29, 3  ;;  %s1334_s15 = scalar_lea.hbm %s1418_s0, %s847_s12 }
  0x40   : > { %s221_s16 = scalar_lea.vmem [#allocation2], %s846_s8  ;;  %p1336_p11 = pnand %p966_p0, %p39_p5 }
  0x41   : > { %s228_s17 = sshll.u32 %s221_s16, 4  ;;  %s218_s27 = scalar_lea.sflag [#allocation3], %s217_s29  ;;  %s229_s17 = int_to_ptr.vmem [resolvable:$true] %s228_s17 }
  0x42   : > { %s1089_s28 = scalar_lea.hbm %s1334_s15, 128  ;;  %p1091_p1 = pneg %p1336_p11 }
  0x43   : > { %p1090_p7 = scmp.ne.s32.totalorder %s1334_s15, %s1089_s28  ;;  %s1094_s9 = scalar_lea.hbm %s1418_s0, 256 }
  0x44   : > { %p1095_p2 = scmp.lt.s32.totalorder %s1334_s15, %s1418_s0  ;;  %p1096_p4 = scmp.lt.s32.totalorder %s1094_s9, %s1089_s28 }
  0x45   : > { %p1092_p9 = pnand %p1091_p1, %p1090_p7 }
  0x46   : > { %p1097_p6 = por %p1096_p4, %p1095_p2 }
  0x47   : > { %p1093_p13 = pneg %p1092_p9 }
  0x49   : > { %p1098_p12 = pnand %p1097_p6, %p1093_p13 }
  0x4b   : > { %1101 = shalt.err (!%p1098_p12)
}
  0x4c   : > { %s1102_s13 = scalar_lea.vmem %s229_s17, 128  ;;  %s1198_s29 = smov [#allocation2]  }
  0x4d   : > { %p1103_p0 = scmp.ne.s32.totalorder %s229_s17, %s1102_s13  ;;  %s1107_s14 = sshll.u32 %s1198_s29, 4  ;;  %s1108_s14 = int_to_ptr.vmem [resolvable:$false] %s1107_s14 }
  0x4e   : > { %s1109_s16 = scalar_lea.vmem %s1108_s14, 256  ;;  %p1110_p7 = scmp.lt.s32.totalorder %s229_s17, %s1108_s14 }
  0x4f   : > { %p1105_p5 = pnand %p1103_p0, %p1091_p1  ;;  %p1111_p9 = scmp.lt.s32.totalorder %s1109_s16, %s1102_s13 }
  0x51   : > { %p1106_p3 = pneg %p1105_p5  ;;  %p1112_p10 = por %p1111_p9, %p1110_p7 }
  0x53   : > { %p1113_p8 = pnand %p1112_p10, %p1106_p3 }
  0x55   : > { %1116 = shalt.err (!%p1113_p8)
}
  0x56   : > { %958 = dma.hbm_to_vmem [thread:$0]  (!%p1336_p11), %s1334_s15, 128, %s229_s17, %s218_s27  }
  0x57   : > { %p1435_p13 = scmp.ne.s32.totalorder %s1430_s26, 0 }
  0x58   : > { %s1357_s28 = sand.u32 (!%p1435_p13), 1, %s1181_s19   ;;  %p1436_p8 = scmp.ne.s32.totalorder (!%p1435_p13), %s1428_s24, 0 }
  0x59   : > { %237 = sbr.rel (%p1435_p13) target bundleno = 549 (0x225), region = 40  ;;  %s849_s30 = sshll.u32 (!%p1435_p13), %s1357_s28, 3 }
  0x5a   : > { %s240_s7 = scalar_lea.sflag (!%p1435_p13), [#allocation3], %s1357_s28  ;;  %s1363_s9 = scalar_lea.vmem (!%p1435_p13), [#allocation2], %s849_s30 }
  0x5e   : > { %1160 = dma.done.wait (%p1436_p8), %s240_s7, 128  }
  0x5f   : > { %1162 = vsyncadd (%p1436_p8), %s240_s7, 4294967168  ;;  %p1437_p10 = scmp.eq.s32.totalorder %s1252_s22, 0 }
  0x61   : > { %1164 = dma.done.wait (%p1437_p10), [#allocation6], 8256   ;;  %p1438_p11 = pmov %p1437_p10 }
  0x62   : > { %p1439_p1 = pmov %p1437_p10 }
  0x63   : > { %1166 = vsyncadd (%p1438_p11), [#allocation6], 4294959040 }
  0x64   : > { %1168 = dma.done.wait (%p1439_p1), [#allocation9], 8192   ;;  %p1440_p2 = pmov %p1439_p1 }
  0x65   : > { %v1199_v0 = vmov 0.0   ;;  %v344_v1 = vld [vmem:[#allocation5 + $0x1e8] sm:$0xff]  ;;  %v346_v2 = vld [vmem:[#allocation5 + $0x1f8] sm:$0xff]  ;;  %v343_v3 = vld [vmem:[#allocation5 + $0x1e0] sm:$0xff]  ;;  %s856_s15 = sshll.u32 %s1252_s22, 7  ;;  %s281_s17 = scalar_lea.vmem [#allocation10], %s849_s30 }
  0x66   : > { %1170 = vsyncadd (%p1440_p2), [#allocation9], 4294959104  ;;  %433 = vmatprep.mubr.f32.mxu0 %v1199_v0  ;;  %504 = vmatprep.mubr.f32.mxu1 %v1199_v0  ;;  %v345_v4 = vld [vmem:[#allocation5 + $0x1f0] sm:$0xff]  ;;  %v340_v5 = vld [vmem:[#allocation5 + $0x1c8] sm:$0xff]  ;;  %s741_s23 = sshll.u32 %s281_s17, 4  ;;  %s739_s8 = scalar_lea.hbm %s1423_s5, %s856_s15  ;;  %s742_s23 = int_to_ptr.vmem [resolvable:$true] %s741_s23 }
  0x67   : > { %369 = vmatprep.subr.mxu0 %v344_v1  ;;  %440 = vmatprep.subr.mxu1 %v346_v2  ;;  %v342_v6 = vld [vmem:[#allocation5 + $0x1d8] sm:$0xff]  ;;  %v339_v7 = vld [vmem:[#allocation5 + $0x1c0] sm:$0xff]  ;;  %v341_v8 = vld [vmem:[#allocation5 + $0x1d0] sm:$0xff]  ;;  %s728_s13 = scalar_lea.sflag [#allocation4], %s1357_s28  ;;  %s1117_s29 = scalar_lea.vmem %s742_s23, 128 }
  0x68   : > { %370 = vmatpush1.msra.mxu0 %v343_v3  ;;  %441 = vmatpush1.msra.mxu1 %v345_v4  ;;  %v336_v9 = vld [vmem:[#allocation5 + $0x1a8] sm:$0xff]  ;;  %v338_v10 = vld [vmem:[#allocation5 + $0x1b8] sm:$0xff]  ;;  %v335_v11 = vld [vmem:[#allocation5 + $0x1a0] sm:$0xff]  ;;  %p1118_p4 = scmp.ne.s32.totalorder %s742_s23, %s1117_s29  ;;  %p1441_p6 = scmp.ne.s32.totalorder %s1433_s11, 0 }
  0x69   : > { %371 = vmatprep.subr.mxu0 %v340_v5  ;;  %442 = vmatprep.subr.mxu1 %v342_v6  ;;  %v337_v12 = vld [vmem:[#allocation5 + $0x1b0] sm:$0xff]  ;;  %v332_v13 = vld [vmem:[#allocation5 + $0x188] sm:$0xff]  ;;  %v334_v14 = vld [vmem:[#allocation5 + $0x198] sm:$0xff]  ;;  %s1200_s14 = smov [#allocation10]  }
  0x6a   : > { %372 = vmatpush1.msra.mxu0 %v339_v7  ;;  %443 = vmatpush1.msra.mxu1 %v341_v8  ;;  %v331_v15 = vld [vmem:[#allocation5 + $0x180] sm:$0xff]  ;;  %v333_v16 = vld [vmem:[#allocation5 + $0x190] sm:$0xff]  ;;  %v328_v17 = vld [vmem:[#allocation5 + $0x168] sm:$0xff]  ;;  %p1119_p12 = pnand %p1118_p4, %p1441_p6  ;;  %s1121_s22 = sshll.u32 %s1200_s14, 4  ;;  %s1122_s22 = int_to_ptr.vmem [resolvable:$false] %s1121_s22 }
  0x6b   : > { %373 = vmatprep.subr.mxu0 %v336_v9  ;;  %444 = vmatprep.subr.mxu1 %v338_v10  ;;  %v330_v18 = vld [vmem:[#allocation5 + $0x178] sm:$0xff]  ;;  %v327_v19 = vld [vmem:[#allocation5 + $0x160] sm:$0xff]  ;;  %v329_v20 = vld [vmem:[#allocation5 + $0x170] sm:$0xff]  ;;  %s1123_s16 = scalar_lea.vmem %s1122_s22, 256  ;;  %p1124_p5 = scmp.lt.s32.totalorder %s742_s23, %s1122_s22 }
  0x6c   : > { %374 = vmatpush1.msra.mxu0 %v335_v11  ;;  %445 = vmatpush1.msra.mxu1 %v337_v12  ;;  %v324_v21 = vld [vmem:[#allocation5 + $0x148] sm:$0xff]  ;;  %v326_v22 = vld [vmem:[#allocation5 + $0x158] sm:$0xff]  ;;  %v323_v23 = vld [vmem:[#allocation5 + $0x140] sm:$0xff]  ;;  %p1120_p0 = pneg %p1119_p12  ;;  %p1125_p3 = scmp.lt.s32.totalorder %s1123_s16, %s1117_s29 }
  0x6d   : > { %375 = vmatprep.subr.mxu0 %v332_v13  ;;  %446 = vmatprep.subr.mxu1 %v334_v14  ;;  %v325_v24 = vld [vmem:[#allocation5 + $0x150] sm:$0xff]  ;;  %v320_v25 = vld [vmem:[#allocation5 + $0x128] sm:$0xff]  ;;  %v322_v26 = vld [vmem:[#allocation5 + $0x138] sm:$0xff] }
  0x6e   : > { %376 = vmatpush1.msra.mxu0 %v331_v15  ;;  %447 = vmatpush1.msra.mxu1 %v333_v16  ;;  %v319_v27 = vld [vmem:[#allocation5 + $0x120] sm:$0xff]  ;;  %v321_v28 = vld [vmem:[#allocation5 + $0x130] sm:$0xff]  ;;  %v316_v29 = vld [vmem:[#allocation5 + $0x108] sm:$0xff]  ;;  %p1126_p7 = por %p1125_p3, %p1124_p5 }
  0x6f   : > { %377 = vmatprep.subr.mxu0 %v328_v17  ;;  %448 = vmatprep.subr.mxu1 %v330_v18  ;;  %v318_v30 = vld [vmem:[#allocation5 + $0x118] sm:$0xff]  ;;  %v315_v31 = vld [vmem:[#allocation5 + $0x100] sm:$0xff]  ;;  %v317_v32 = vld [vmem:[#allocation5 + $0x110] sm:$0xff] }
  0x70   : > { %378 = vmatpush1.msra.mxu0 %v327_v19  ;;  %449 = vmatpush1.msra.mxu1 %v329_v20  ;;  %v312_v33 = vld [vmem:[#allocation5 + $0xe8] sm:$0xff]  ;;  %v314_v34 = vld [vmem:[#allocation5 + $0xf8] sm:$0xff]  ;;  %v311_v35 = vld [vmem:[#allocation5 + $0xe0] sm:$0xff]  ;;  %p1127_p9 = pnand %p1126_p7, %p1120_p0 }
  0x71   : > { %379 = vmatprep.subr.mxu0 %v324_v21  ;;  %450 = vmatprep.subr.mxu1 %v326_v22  ;;  %v313_v36 = vld [vmem:[#allocation5 + $0xf0] sm:$0xff]  ;;  %v308_v37 = vld [vmem:[#allocation5 + $0xc8] sm:$0xff]  ;;  %v310_v38 = vld [vmem:[#allocation5 + $0xd8] sm:$0xff] }
  0x72   : > { %380 = vmatpush1.msra.mxu0 %v323_v23  ;;  %451 = vmatpush1.msra.mxu1 %v325_v24  ;;  %v307_v39 = vld [vmem:[#allocation5 + $0xc0] sm:$0xff]  ;;  %v309_v40 = vld [vmem:[#allocation5 + $0xd0] sm:$0xff]  ;;  %v304_v41 = vld [vmem:[#allocation5 + $0xa8] sm:$0xff] }
  0x73   : > { %381 = vmatprep.subr.mxu0 %v320_v25  ;;  %452 = vmatprep.subr.mxu1 %v322_v26  ;;  %v306_v42 = vld [vmem:[#allocation5 + $0xb8] sm:$0xff]  ;;  %v303_v43 = vld [vmem:[#allocation5 + $0xa0] sm:$0xff]  ;;  %v305_v44 = vld [vmem:[#allocation5 + $0xb0] sm:$0xff] }
  0x74   : > { %382 = vmatpush1.msra.mxu0 %v319_v27  ;;  %453 = vmatpush1.msra.mxu1 %v321_v28  ;;  %v300_v45 = vld [vmem:[#allocation5 + $0x88] sm:$0xff]  ;;  %v302_v46 = vld [vmem:[#allocation5 + $0x98] sm:$0xff]  ;;  %v299_v47 = vld [vmem:[#allocation5 + $0x80] sm:$0xff] }
  0x75   : > { %383 = vmatprep.subr.mxu0 %v316_v29  ;;  %454 = vmatprep.subr.mxu1 %v318_v30  ;;  %v301_v48 = vld [vmem:[#allocation5 + $0x90] sm:$0xff]  ;;  %v296_v49 = vld [vmem:[#allocation5 + $0x68] sm:$0xff]  ;;  %v298_v50 = vld [vmem:[#allocation5 + $0x78] sm:$0xff] }
  0x76   : > { %384 = vmatpush1.msra.mxu0 %v315_v31  ;;  %455 = vmatpush1.msra.mxu1 %v317_v32  ;;  %v295_v51 = vld [vmem:[#allocation5 + $0x60] sm:$0xff]  ;;  %v297_v52 = vld [vmem:[#allocation5 + $0x70] sm:$0xff]  ;;  %v292_v53 = vld [vmem:[#allocation5 + $0x48] sm:$0xff] }
  0x77   : > { %385 = vmatprep.subr.mxu0 %v312_v33  ;;  %456 = vmatprep.subr.mxu1 %v314_v34  ;;  %v294_v54 = vld [vmem:[#allocation5 + $0x58] sm:$0xff]  ;;  %v291_v55 = vld [vmem:[#allocation5 + $0x40] sm:$0xff]  ;;  %v293_v56 = vld [vmem:[#allocation5 + $0x50] sm:$0xff] }
  0x78   : > { %386 = vmatpush1.msra.mxu0 %v311_v35  ;;  %457 = vmatpush1.msra.mxu1 %v313_v36  ;;  %v288_v57 = vld [vmem:[#allocation5 + $0x28] sm:$0xff]  ;;  %v290_v58 = vld [vmem:[#allocation5 + $0x38] sm:$0xff]  ;;  %v287_v59 = vld [vmem:[#allocation5 + $0x20] sm:$0xff] }
  0x79   : > { %387 = vmatprep.subr.mxu0 %v308_v37  ;;  %458 = vmatprep.subr.mxu1 %v310_v38  ;;  %v289_v60 = vld [vmem:[#allocation5 + $0x30] sm:$0xff]  ;;  %v284_v61 = vld [vmem:[#allocation5 + $0x8] sm:$0xff]  ;;  %v286_v62 = vld [vmem:[#allocation5 + $0x18] sm:$0xff] }
  0x7a   : > { %388 = vmatpush1.msra.mxu0 %v307_v39  ;;  %459 = vmatpush1.msra.mxu1 %v309_v40  ;;  %v283_v63 = vld [vmem:[#allocation5] sm:$0xff]  ;;  %v285_v0 = vld [vmem:[#allocation5 + $0x10] sm:$0xff] }
  0x7b   : > { %389 = vmatprep.subr.mxu0 %v304_v41  ;;  %460 = vmatprep.subr.mxu1 %v306_v42  ;;  %v282_v1 = vld [vmem:[%s1363_s9] sm:$0xff]  ;;  %v543_v14 = vld [vmem:[#allocation8 + $0xe0] sm:$0xff] }
  0x7c   : > { %390 = vmatpush1.msra.mxu0 %v303_v43  ;;  %461 = vmatpush1.msra.mxu1 %v305_v44  ;;  %v546_v2 = vld [vmem:[#allocation8 + $0xf8] sm:$0xff]  ;;  %v545_v6 = vld [vmem:[#allocation8 + $0xf0] sm:$0xff]  ;;  %v544_v10 = vld [vmem:[#allocation8 + $0xe8] sm:$0xff] }
  0x7d   : > { %391 = vmatprep.subr.mxu0 %v300_v45  ;;  %462 = vmatprep.subr.mxu1 %v302_v46  ;;  %v578_v3 = vld [vmem:[#allocation8 + $0x1f8] sm:$0xff]  ;;  %v577_v7 = vld [vmem:[#allocation8 + $0x1f0] sm:$0xff]  ;;  %v576_v11 = vld [vmem:[#allocation8 + $0x1e8] sm:$0xff] }
  0x7e   : > { %392 = vmatpush1.msra.mxu0 %v299_v47  ;;  %463 = vmatpush1.msra.mxu1 %v301_v48  ;;  %v530_v4 = vld [vmem:[#allocation8 + $0x78] sm:$0xff]  ;;  %v529_v8 = vld [vmem:[#allocation8 + $0x70] sm:$0xff]  ;;  %v528_v12 = vld [vmem:[#allocation8 + $0x68] sm:$0xff] }
  0x7f   : > { %393 = vmatprep.subr.mxu0 %v296_v49  ;;  %464 = vmatprep.subr.mxu1 %v298_v50  ;;  %v562_v5 = vld [vmem:[#allocation8 + $0x178] sm:$0xff]  ;;  %v561_v9 = vld [vmem:[#allocation8 + $0x170] sm:$0xff]  ;;  %v560_v13 = vld [vmem:[#allocation8 + $0x168] sm:$0xff] }
  0x80   : > { %394 = vmatpush1.msra.mxu0 %v295_v51  ;;  %465 = vmatpush1.msra.mxu1 %v297_v52  ;;  %v575_v15 = vld [vmem:[#allocation8 + $0x1e0] sm:$0xff]  ;;  %v542_v18 = vld [vmem:[#allocation8 + $0xd8] sm:$0xff]  ;;  %v541_v22 = vld [vmem:[#allocation8 + $0xd0] sm:$0xff] }
  0x81   : > { %395 = vmatprep.subr.mxu0 %v292_v53  ;;  %466 = vmatprep.subr.mxu1 %v294_v54  ;;  %v527_v16 = vld [vmem:[#allocation8 + $0x60] sm:$0xff]  ;;  %v574_v19 = vld [vmem:[#allocation8 + $0x1d8] sm:$0xff]  ;;  %v573_v23 = vld [vmem:[#allocation8 + $0x1d0] sm:$0xff] }
  0x82   : > { %396 = vmatpush1.msra.mxu0 %v291_v55  ;;  %467 = vmatpush1.msra.mxu1 %v293_v56  ;;  %v559_v17 = vld [vmem:[#allocation8 + $0x160] sm:$0xff]  ;;  %v526_v20 = vld [vmem:[#allocation8 + $0x58] sm:$0xff]  ;;  %v525_v24 = vld [vmem:[#allocation8 + $0x50] sm:$0xff] }
  0x83   : > { %397 = vmatprep.subr.mxu0 %v288_v57  ;;  %468 = vmatprep.subr.mxu1 %v290_v58  ;;  %v558_v21 = vld [vmem:[#allocation8 + $0x158] sm:$0xff]  ;;  %v557_v25 = vld [vmem:[#allocation8 + $0x150] sm:$0xff]  ;;  %v540_v26 = vld [vmem:[#allocation8 + $0xc8] sm:$0xff] }
  0x84   : > { %398 = vmatpush1.msra.mxu0 %v287_v59  ;;  %469 = vmatpush1.msra.mxu1 %v289_v60  ;;  %v572_v27 = vld [vmem:[#allocation8 + $0x1c8] sm:$0xff]  ;;  %v539_v30 = vld [vmem:[#allocation8 + $0xc0] sm:$0xff]  ;;  %v538_v34 = vld [vmem:[#allocation8 + $0xb8] sm:$0xff] }
  0x85   : > { %399 = vmatprep.subr.mxu0 %v284_v61  ;;  %470 = vmatprep.subr.mxu1 %v286_v62  ;;  %v524_v28 = vld [vmem:[#allocation8 + $0x48] sm:$0xff]  ;;  %v571_v31 = vld [vmem:[#allocation8 + $0x1c0] sm:$0xff]  ;;  %v570_v35 = vld [vmem:[#allocation8 + $0x1b8] sm:$0xff] }
  0x86   : > { %400 = vmatpush1.msra.mxu0 %v283_v63  ;;  %471 = vmatpush1.msra.mxu1 %v285_v0  ;;  %v556_v29 = vld [vmem:[#allocation8 + $0x148] sm:$0xff]  ;;  %v523_v32 = vld [vmem:[#allocation8 + $0x40] sm:$0xff]  ;;  %v522_v36 = vld [vmem:[#allocation8 + $0x38] sm:$0xff] }
  0x87   : > { %434 = vmatmul.mubr.f32.vlgmr.msra.gmra.mxu0 %v282_v1  ;;  %505 = vmatmul.mubr.f32.vlgmr.msra.gmra.mxu1 %v282_v1  ;;  %v555_v33 = vld [vmem:[#allocation8 + $0x140] sm:$0xff]  ;;  %v554_v37 = vld [vmem:[#allocation8 + $0x138] sm:$0xff]  ;;  %v537_v38 = vld [vmem:[#allocation8 + $0xb0] sm:$0xff] }
  0x88   : > { %859 = vmatprep.subr.mxu0 %v546_v2  ;;  %894 = vmatprep.subr.mxu1 %v578_v3  ;;  %v569_v39 = vld [vmem:[#allocation8 + $0x1b0] sm:$0xff]  ;;  %v536_v42 = vld [vmem:[#allocation8 + $0xa8] sm:$0xff]  ;;  %v535_v46 = vld [vmem:[#allocation8 + $0xa0] sm:$0xff]  ;;  %v349_v2 = vlaneseq }
  0x89   : > { %860 = vmatpush3.msra.mxu0 %v530_v4  ;;  %895 = vmatpush3.msra.mxu1 %v562_v5  ;;  %v521_v40 = vld [vmem:[#allocation8 + $0x30] sm:$0xff]  ;;  %v568_v43 = vld [vmem:[#allocation8 + $0x1a8] sm:$0xff]  ;;  %v567_v47 = vld [vmem:[#allocation8 + $0x1a0] sm:$0xff] }
  0x8a   : > { %861 = vmatprep.subr.mxu0 %v545_v6  ;;  %896 = vmatprep.subr.mxu1 %v577_v7  ;;  %v553_v41 = vld [vmem:[#allocation8 + $0x130] sm:$0xff]  ;;  %v520_v44 = vld [vmem:[#allocation8 + $0x28] sm:$0xff]  ;;  %v519_v48 = vld [vmem:[#allocation8 + $0x20] sm:$0xff]  ;;  %v350_v3 = vshrl.u32 %v349_v2, 7 }
  0x8b   : > { %862 = vmatpush3.msra.mxu0 %v529_v8  ;;  %897 = vmatpush3.msra.mxu1 %v561_v9  ;;  %v552_v45 = vld [vmem:[#allocation8 + $0x128] sm:$0xff]  ;;  %v551_v49 = vld [vmem:[#allocation8 + $0x120] sm:$0xff]  ;;  %v534_v50 = vld [vmem:[#allocation8 + $0x98] sm:$0xff] }
  0x8c   : > { %863 = vmatprep.subr.mxu0 %v544_v10  ;;  %898 = vmatprep.subr.mxu1 %v576_v11  ;;  %v566_v51 = vld [vmem:[#allocation8 + $0x198] sm:$0xff]  ;;  %v533_v54 = vld [vmem:[#allocation8 + $0x90] sm:$0xff]  ;;  %v532_v58 = vld [vmem:[#allocation8 + $0x88] sm:$0xff]  ;;  %v359_v4 = vsub.s32 2, %v350_v3  ;;  %v351_v5 = vsub.s32 0, %v350_v3  ;;  %v355_v7 = vsub.s32 1, %v350_v3 }
  0x8d   : > { %864 = vmatpush3.msra.mxu0 %v528_v12  ;;  %899 = vmatpush3.msra.mxu1 %v560_v13  ;;  %v518_v52 = vld [vmem:[#allocation8 + $0x18] sm:$0xff]  ;;  %v565_v55 = vld [vmem:[#allocation8 + $0x190] sm:$0xff]  ;;  %v564_v59 = vld [vmem:[#allocation8 + $0x188] sm:$0xff]  ;;  %v363_v8 = vsub.s32 3, %v350_v3 }
  0x8e   : > { %865 = vmatprep.subr.mxu0 %v543_v14  ;;  %900 = vmatprep.subr.mxu1 %v575_v15  ;;  %v550_v53 = vld [vmem:[#allocation8 + $0x118] sm:$0xff]  ;;  %v517_v56 = vld [vmem:[#allocation8 + $0x10] sm:$0xff]  ;;  %v516_v60 = vld [vmem:[#allocation8 + $0x8] sm:$0xff] }
  0x8f   : > { %866 = vmatpush3.msra.mxu0 %v527_v16  ;;  %901 = vmatpush3.msra.mxu1 %v559_v17  ;;  %v549_v57 = vld [vmem:[#allocation8 + $0x110] sm:$0xff]  ;;  %v548_v61 = vld [vmem:[#allocation8 + $0x108] sm:$0xff]  ;;  %v531_v62 = vld [vmem:[#allocation8 + $0x80] sm:$0xff] }
  0x90   : > { %867 = vmatprep.subr.mxu0 %v542_v18  ;;  %902 = vmatprep.subr.mxu1 %v574_v19  ;;  %v563_v63 = vld [vmem:[#allocation8 + $0x180] sm:$0xff]  ;;  %v347_v6 = vld [vmem:[#allocation7] sm:$0xf] }
  0x91   : > { %868 = vmatpush3.msra.mxu0 %v526_v20  ;;  %903 = vmatpush3.msra.mxu1 %v558_v21  ;;  %v515_v0 = vld [vmem:[#allocation8] sm:$0xff]  ;;  %v360_v9 = vrot.slane %v347_v6, %v359_v4  ;;  %v352_v10 = vrot.slane %v347_v6, %v351_v5  ;;  %v356_v11 = vrot.slane %v347_v6, %v355_v7 }
  0x92   : > { %869 = vmatprep.subr.mxu0 %v541_v22  ;;  %904 = vmatprep.subr.mxu1 %v573_v23  ;;  %v547_v1 = vld [vmem:[#allocation8 + $0x100] sm:$0xff]  ;;  %v364_v12 = vrot.slane %v347_v6, %v363_v8 }
  0x93   : > { %870 = vmatpush3.msra.mxu0 %v525_v24  ;;  %905 = vmatpush3.msra.mxu1 %v557_v25 }
  0x94   : > { %871 = vmatprep.subr.mxu0 %v540_v26  ;;  %906 = vmatprep.subr.mxu1 %v572_v27  ;;  %v854_v27 = vld [vmem:[%s1422_s4] ss:$0 sm:$0xff] }
  0x95   : > { %872 = vmatpush3.msra.mxu0 %v524_v28  ;;  %907 = vmatpush3.msra.mxu1 %v556_v29 }
  0x96   : > { %873 = vmatprep.subr.mxu0 %v539_v30  ;;  %908 = vmatprep.subr.mxu1 %v571_v31 }
  0x97   : > { %874 = vmatpush3.msra.mxu0 %v523_v32  ;;  %909 = vmatpush3.msra.mxu1 %v555_v33 }
  0x98   : > { %875 = vmatprep.subr.mxu0 %v538_v34  ;;  %910 = vmatprep.subr.mxu1 %v570_v35 }
  0x99   : > { %876 = vmatpush3.msra.mxu0 %v522_v36  ;;  %911 = vmatpush3.msra.mxu1 %v554_v37 }
  0x9a   : > { %877 = vmatprep.subr.mxu0 %v537_v38  ;;  %912 = vmatprep.subr.mxu1 %v569_v39 }
  0x9b   : > { %878 = vmatpush3.msra.mxu0 %v521_v40  ;;  %913 = vmatpush3.msra.mxu1 %v553_v41 }
  0x9c   : > { %879 = vmatprep.subr.mxu0 %v536_v42  ;;  %914 = vmatprep.subr.mxu1 %v568_v43 }
  0x9d   : > { %880 = vmatpush3.msra.mxu0 %v520_v44  ;;  %915 = vmatpush3.msra.mxu1 %v552_v45 }
  0x9e   : > { %881 = vmatprep.subr.mxu0 %v535_v46  ;;  %916 = vmatprep.subr.mxu1 %v567_v47 }
  0x9f   : > { %882 = vmatpush3.msra.mxu0 %v519_v48  ;;  %917 = vmatpush3.msra.mxu1 %v551_v49 }
  0xa0   : > { %883 = vmatprep.subr.mxu0 %v534_v50  ;;  %918 = vmatprep.subr.mxu1 %v566_v51 }
  0xa1   : > { %884 = vmatpush3.msra.mxu0 %v518_v52  ;;  %919 = vmatpush3.msra.mxu1 %v550_v53 }
  0xa2   : > { %885 = vmatprep.subr.mxu0 %v533_v54  ;;  %920 = vmatprep.subr.mxu1 %v565_v55 }
  0xa3   : > { %886 = vmatpush3.msra.mxu0 %v517_v56  ;;  %921 = vmatpush3.msra.mxu1 %v549_v57 }
  0xa4   : > { %887 = vmatprep.subr.mxu0 %v532_v58  ;;  %922 = vmatprep.subr.mxu1 %v564_v59 }
  0xa5   : > { %888 = vmatpush3.msra.mxu0 %v516_v60  ;;  %923 = vmatpush3.msra.mxu1 %v548_v61 }
  0xa6   : > { %889 = vmatprep.subr.mxu0 %v531_v62  ;;  %924 = vmatprep.subr.mxu1 %v563_v63 }
  0xa7   : > { %890 = vmatpush3.msra.mxu0 %v515_v0  ;;  %925 = vmatpush3.msra.mxu1 %v547_v1 }
 0x147   : > { %v435_v13 = vpop.f32.mrf.mxu0  ;;  %v506_v14 = vpop.f32.mrf.mxu1 }
 0x148   : > { %v507_v15 = vadd.f32 %v506_v14, %v360_v9  ;;  %v436_v16 = vadd.f32 %v435_v13, %v352_v10 }
 0x149   : > { %v437_v17 = vpop.f32.mrf.mxu0  ;;  %v508_v18 = vpop.f32.mrf.mxu1 }
 0x14a   : > { %v438_v19 = vadd.f32 %v437_v17, %v356_v11  ;;  %v509_v20 = vadd.f32 %v508_v18, %v364_v12  ;;  %v513_v21 = vmax.f32 %v507_v15, 0.0  ;;  %v511_v24 = vmax.f32 %v436_v16, 0.0 }
 0x14c   : > { %v512_v22 = vmax.f32 %v438_v19, 0.0  ;;  %v514_v23 = vmax.f32 %v509_v20, 0.0 }
 0x14e   : > { %650 = vmatprep.mubr.f32.mxu0 %v512_v22  ;;  %720 = vmatprep.mubr.f32.mxu1 %v514_v23 }
 0x14f   : > { %651 = vmatmul.mubr.f32.vlgmr.msra.gmra.mxu0 %v511_v24  ;;  %721 = vmatmul.mubr.f32.vlgmr.msra.gmra.mxu1 %v513_v21 }
 0x20f   : > { %v891_v25 = vpop.f32.mrf.mxu0  ;;  %v926_v26 = vpop.f32.mrf.mxu1 }
 0x211   : > { %v892_v28 = vpop.f32.mrf.mxu0  ;;  %v927_v29 = vpop.f32.mrf.mxu1 }
 0x212   : > { %v893_v30 = vadd.f32 %v892_v28, %v891_v25  ;;  %v928_v32 = vadd.f32 %v927_v29, %v926_v26 }
 0x214   : > { %v653_v31 = vadd.f32 %v893_v30, %v854_v27 }
 0x216   : > { %v723_v33 = vadd.f32 %v928_v32, %v653_v31 }
 0x218   : > { %726 = vst [vmem:[%s281_s17] sm:$0xff] %v723_v33 }
 0x219   : > { %1130 = shalt.err (!%p1127_p9)
}
 0x21a   : > { %s1131_s30 = scalar_lea.hbm %s739_s8, 128  ;;  %s1135_s9 = scalar_lea.hbm %s1423_s5, 256 }
 0x21b   : > { %p1132_p13 = scmp.ne.s32.totalorder %s739_s8, %s1131_s30  ;;  %p1136_p11 = scmp.lt.s32.totalorder %s739_s8, %s1423_s5 }
 0x21c   : > { %p1137_p1 = scmp.lt.s32.totalorder %s1135_s9, %s1131_s30 }
 0x21d   : > { %p1133_p8 = pnand %p1132_p13, %p1441_p6 }
 0x21e   : > { %p1138_p2 = por %p1137_p1, %p1136_p11 }
 0x21f   : > { %p1134_p10 = pneg %p1133_p8 }
 0x221   : > { %p1139_p4 = pnand %p1138_p2, %p1134_p10 }
 0x223   : > { %1142 = shalt.err (!%p1139_p4)
}
 0x224   : > { %943 = dma.vmem_to_hbm [thread:$0]  (%p1441_p6), %s742_s23, 128, %s739_s8, %s728_s13  }
 0x225 PF: > { %s753_s15 = sand.u32 1, %s1177_s18   ;;  %p1442_p12 = scmp.ne.s32.totalorder %s1429_s25, 0 }
 0x226   : > { %p1443_p0 = scmp.ge.s32.totalorder %s1189_s21, 2  ;;  %s754_s17 = scalar_lea.sflag [#allocation4], %s753_s15 }
 0x228   : > { %p960_p5 = pnand %p1443_p0, %p1442_p12 }
 0x22a   : > { %p961_p3 = pneg %p960_p5 }
 0x22c   : > { %1172 = dma.done.wait (%p961_p3), %s754_s17, 128  }
 0x22d   : > { %1174 = vsyncadd (%p961_p3), %s754_s17, 4294967168  ;;  %p20_p7 = scmp.ge.s32.totalorder %s1311_s6, 4   ;;  %s1444_s18 = smov %s1181_s19 }
 0x22e   : > { %s1445_s19 = smov %s1185_s20  ;;  %s1446_s20 = smov %s1321_s10 }
 0x22f   : > { %s1447_s21 = smov %s1311_s6  ;;  %22 = sbr.rel (!%p20_p7) target bundleno = 7 (0x7), region = 97 }
 0x234   :  { %759 = vsyncpa [#allocation3], 1 }
 0x235   :  { %761 = vsyncpa [#allocation3 + $0x1], 1 }
 0x236   :  { %762 = vsyncpa [#allocation6], 1 }
 0x237   :  { %763 = vsyncpa [#allocation9], 1 }
 0x238   :  { %764 = vsyncpa [#allocation4], 1 }
 0x239   :  { %766 = vsyncpa [#allocation4 + $0x1], 1 }

</bundles_post_ra>
